<compile_context>
chip_gen: v5e
topology: v5e:2x2
jax: 0.10.0
libtpu: 0.0.40
codegen_flags: <defaults>
</compile_context>

<pallas_src>
import functools

import jax
import jax.numpy as jnp
from jax.experimental import pallas as pl
from jax.experimental.pallas import tpu as pltpu


def _debedder_kernel(x_ref, w_ref, b_ref, o_ref, *, chunk):
    # x_ref: (tm, D)  tile of rows, VMEM, x.dtype
    # w_ref: (1, D)   nn.Linear(d_model, 1).weight, VMEM-resident (constant block)
    # b_ref: (1, 1)   bias (f32), SMEM (scalar path)
    # o_ref: (1, tm)  lane-dense per-row projection result
    tm, d = x_ref.shape
    n_chunks = pl.cdiv(d, chunk)

    # Chunked reduction over D: per-iteration f32 intermediate is (tm, chunk)
    # (~<=2 MiB) instead of (tm, D). Static (compile-time) chunk starts, so
    # this is equivalent to a fully-unrolled fori_loop with aligned loads.
    acc = jnp.zeros((tm,), dtype=jnp.float32)
    for c in range(n_chunks):
        start = c * chunk
        size = min(chunk, d - start)
        xs = x_ref[:, start:start + size]      # (tm, size), x.dtype
        ws = w_ref[:, start:start + size]      # (1, size), broadcasts over sublanes
        acc = acc + jnp.sum(xs * ws, axis=-1, dtype=jnp.float32)

    y = acc + b_ref[0, 0]                               # (tm,) f32 row results
    o_ref[...] = y.reshape(1, tm).astype(o_ref.dtype)   # lane-dense store


def _vmem_capacity_bytes():
    """Physical VMEM per core; conservative fallback (v7x: 64 MiB)."""
    try:
        info = pltpu.get_tpu_info()
        cap = getattr(info, "vmem_capacity_bytes", None)
        if cap:
            return int(cap)
    except Exception:
        pass
    return 64 * 1024 * 1024


def debedder_forward(x, weight, bias, *, tm=None, chunk=None):
    """x: (batch, seq, d_model); weight: (1, d_model); bias: (1,).

    Matches torch's `self.weight_debedder(x).squeeze()` (all size-1 dims
    squeezed, like torch .squeeze()).
    """
    batch, seq, d_model = x.shape
    n_rows = batch * seq
    itemsize = jnp.dtype(x.dtype).itemsize

    x2d = x.reshape(n_rows, d_model)                   # contiguous reshape: no copy
    w2d = weight.reshape(1, d_model).astype(x.dtype)   # keep the multiply in x.dtype
    b2d = bias.reshape(1, 1).astype(jnp.float32)       # scalar path (SMEM), f32 add

    # ---- tile sizing from physical VMEM ------------------------------------
    vmem_cap = _vmem_capacity_bytes()
    per_buf = min(32 * 1024 * 1024, vmem_cap // 4)     # per x-tile buffer (double-buffered)
    if tm is None:
        tm = per_buf // max(1, d_model * itemsize)
        tm = max(8, min(4096, (tm // 128) * 128))
    if n_rows >= 8:
        tm = min(tm, (n_rows // 8) * 8)                # sublane-aligned, <= n_rows
        if tm >= 128:
            tm = (tm // 128) * 128                     # lane-dense output stores
    else:
        tm = 0                                         # too few rows for a kernel tile

    n_tiles = (n_rows // tm) if tm > 0 else 0
    n_full = n_tiles * tm
    n_rem = n_rows - n_full

    if chunk is None:
        # Cap the per-chunk f32 intermediate at ~2 MiB.
        chunk = (2 * 1024 * 1024) // max(1, (tm if tm > 0 else 1) * 4)
        chunk = max(128, (chunk // 128) * 128)
    chunk = max(1, min(chunk, d_model))

    # Scoped VMEM: 2 x-tile buffers + chunk intermediates + headroom, HW-capped.
    vmem_limit = int(min(vmem_cap - 4 * 1024 * 1024, 2 * per_buf + 24 * 1024 * 1024))
    vmem_limit = max(vmem_limit, 32 * 1024 * 1024)

    parts = []
    if n_tiles > 0:
        out_row = pl.pallas_call(
            functools.partial(_debedder_kernel, chunk=chunk),
            out_shape=jax.ShapeDtypeStruct((1, n_full), x.dtype),
            grid_spec=pltpu.PrefetchScalarGridSpec(
                num_scalar_prefetch=0,
                grid=(n_tiles,),
                in_specs=[
                    pl.BlockSpec((tm, d_model), lambda i: (i, 0)),
                    pl.BlockSpec((1, d_model), lambda i: (0, 0)),   # weight resident
                    pl.BlockSpec(memory_space=pltpu.MemorySpace.SMEM),
                ],
                out_specs=pl.BlockSpec((1, tm), lambda i: (0, i)),
            ),
            compiler_params=pltpu.CompilerParams(
                # TODO(synk): verify on v7x that "parallel" shards across both
                # TensorCores; switch to pltpu.CORE_PARALLEL if it does not.
                dimension_semantics=("parallel",),
                vmem_limit_bytes=vmem_limit,
            ),
            cost_estimate=pl.CostEstimate(
                flops=2 * n_full * d_model,
                transcendentals=0,
                bytes_accessed=n_full * d_model * itemsize
                + n_full * itemsize
                + d_model * itemsize,
            ),
        )(x2d, w2d, b2d)
        parts.append(out_row.reshape(n_full))

    if n_rem > 0:
        # Tail (< tm rows): tiny plain-XLA dot instead of padding/copying all of x.
        tail = x2d[n_full:]
        y_tail = (
            jnp.einsum("rd,d->r", tail, w2d[0], preferred_element_type=jnp.float32)
            + b2d[0, 0]
        )
        parts.append(y_tail.astype(x.dtype))

    y_flat = parts[0] if len(parts) == 1 else jnp.concatenate(parts)
    return jnp.squeeze(y_flat.reshape(batch, seq, 1))


if __name__ == "__main__":
    # Small shapes implied by the forward: x is (batch, seq, d_model).
    batch, seq, d_model = 2, 8, 128
    input_dim = seq  # unused by forward; kept for parity with Debedder.__init__

    key = jax.random.PRNGKey(0)
    kx, kw, kb = jax.random.split(key, 3)

    x = jax.random.normal(kx, (batch, seq, d_model), dtype=jnp.float32)

    # Deterministic parameter init mimicking nn.Linear(d_model, 1):
    # uniform(-1/sqrt(d_model), 1/sqrt(d_model)) for weight and bias.
    bound = 1.0 / (d_model ** 0.5)
    weight = jax.random.uniform(
        kw, (1, d_model), minval=-bound, maxval=bound, dtype=jnp.float32
    )
    bias = jax.random.uniform(
        kb, (1,), minval=-bound, maxval=bound, dtype=jnp.float32
    )

    y = debedder_forward(x, weight, bias)
    y = jax.block_until_ready(y)

    # Pure-JAX reference check.
    y_ref = jnp.squeeze(
        jnp.einsum("bsd,od->bso", x, weight) + bias[None, None, :]
    )
    assert y.shape == (batch, seq), y.shape
    assert jnp.allclose(y, y_ref, atol=1e-5, rtol=1e-5), float(
        jnp.max(jnp.abs(y - y_ref))
    )

    print("KERNEL_OK")
</pallas_src>

<mosaic_0001>
module attributes {stable_mosaic.version = 11 : i64} {
  func.func @_debedder_kernel(%arg0: i32, %arg1: memref<16x128xf32, #tpu.memory_space<vmem>>, %arg2: memref<1x128xf32, #tpu.memory_space<vmem>>, %arg3: memref<1x1xf32, #tpu.memory_space<smem>>, %arg4: memref<1x16xf32, #tpu.memory_space<vmem>>) attributes {dimension_semantics = [#tpu.dimension_semantics<parallel>], iteration_bounds = array<i64: 1>, scalar_prefetch = 0 : i64, scratch_operands = 0 : i64, tpu.core_type = #tpu.core_type<tc>, window_params = [{transform_indices = @transform_0, window_bounds = array<i64: 16, 128>}, {pipeline_mode = #tpu.pipeline_mode<synchronous>, transform_indices = @transform_1, window_bounds = array<i64: 1, 128>}, {transform_indices = @transform_2, window_bounds = array<i64: 1, 1>}, {transform_indices = @transform_3, window_bounds = array<i64: 1, 16>}]} {
    %cst = arith.constant 0.000000e+00 : f32
    %0 = vector.broadcast %cst : f32 to vector<16xf32>
    %c0 = arith.constant 0 : index
    %c0_0 = arith.constant 0 : index
    %1 = vector.load %arg1[%c0, %c0_0] : memref<16x128xf32, #tpu.memory_space<vmem>>, vector<16x128xf32>
    %c0_1 = arith.constant 0 : index
    %c0_2 = arith.constant 0 : index
    %2 = vector.load %arg2[%c0_1, %c0_2] : memref<1x128xf32, #tpu.memory_space<vmem>>, vector<1x128xf32>
    %3 = vector.broadcast %2 : vector<1x128xf32> to vector<16x128xf32>
    %4 = arith.mulf %1, %3 : vector<16x128xf32>
    %cst_3 = arith.constant dense<0.000000e+00> : vector<16xf32>
    %5 = vector.multi_reduction <add>, %4, %cst_3 [1] : vector<16x128xf32> to vector<16xf32>
    %6 = arith.addf %0, %5 : vector<16xf32>
    %c0_4 = arith.constant 0 : index
    %c0_5 = arith.constant 0 : index
    %7 = memref.load %arg3[%c0_4, %c0_5] : memref<1x1xf32, #tpu.memory_space<smem>>
    %8 = vector.broadcast %7 : f32 to vector<16xf32>
    %9 = arith.addf %6, %8 : vector<16xf32>
    %10 = vector.shape_cast %9 : vector<16xf32> to vector<1x16xf32>
    %c0_6 = arith.constant 0 : index
    %c0_7 = arith.constant 0 : index
    %11 = vector.load %arg4[%c0_6, %c0_7] : memref<1x16xf32, #tpu.memory_space<vmem>>, vector<1x16xf32>
    tpu.vector_store %arg4[%c0_6, %c0_7], %10 {strides = array<i32>} : memref<1x16xf32, #tpu.memory_space<vmem>>, vector<1x16xf32>,
    return
  }
  func.func @transform_0(%arg0: i32) -> (i32, i32) {
    %c0_i32 = arith.constant 0 : i32
    %c0_i32_0 = arith.constant 0 : i32
    return %arg0, %c0_i32 : i32, i32
  }
  func.func @transform_1(%arg0: i32) -> (i32, i32) {
    %c0_i32 = arith.constant 0 : i32
    %c0_i32_0 = arith.constant 0 : i32
    %c0_i32_1 = arith.constant 0 : i32
    return %c0_i32, %c0_i32_0 : i32, i32
  }
  func.func @transform_2(%arg0: i32) -> (i32, i32) {
    %c0_i32 = arith.constant 0 : i32
    %c0_i32_0 = arith.constant 0 : i32
    %c0_i32_1 = arith.constant 0 : i32
    return %c0_i32, %c0_i32_0 : i32, i32
  }
  func.func @transform_3(%arg0: i32) -> (i32, i32) {
    %c0_i32 = arith.constant 0 : i32
    %c0_i32_0 = arith.constant 0 : i32
    return %c0_i32, %arg0 : i32, i32
  }
}

</mosaic_0001>

<bundles_post_ra>
// kernel: tpu_custom_call.1
= control target key start
LH: loop header
LB: loop body
LE: loop exit
PB: predicated region body
PF: predicated region fallthrough
CT: control target
= control target key end

     0   :  { %9 = vsyncpa [#allocation4], 0  ;;  %s172_s0 = inlined_call_operand.hbm [shape: f32[16,128], index: 0, kind: input, shape index: {}]   ;;  %s173_s1 = inlined_call_operand.vmem [shape: f32[1,128], index: 1, kind: input, shape index: {}]   ;;  %s174_s2 = inlined_call_operand.<no memory space> [shape: f32[1,1], index: 2, kind: input, shape index: {}]   ;;  %s175_s3 = inlined_call_operand.hbm [shape: f32[1,16], index: 3, kind: output, shape index: {}]  }
   0x1   :  { %10 = vsyncpa [#allocation5], 0  ;;  %s15_s14 = sshll.u32 %s172_s0, 4  ;;  %s136_s15 = smov [#allocation3]   ;;  %s16_s14 = int_to_ptr.hbm [resolvable:$true] %s15_s14 }
   0x2   :  { %s17_s16 = sshll.u32 %s136_s15, 4  ;;  %s137_s17 = smov 128   ;;  %s18_s16 = int_to_ptr.vmem [resolvable:$true] %s17_s16 }
   0x3   :  { %s138_s18 = smov 8  }
   0x4   :  { %23 = dma.hbm_to_vmem [thread:$0]  %s16_s14, 256, %s18_s16, [#allocation4], %s137_s17, %s137_s17, %s138_s18  }
   0x5   :  { %132 = dma.done.wait [#allocation4], 256  }
   0x6   :  { %133 = vsyncadd [#allocation4], 4294967040  ;;  %v32_v0 = vld [vmem:[#allocation3] sm:$0xff]  ;;  %v33_v3 = vld [vmem:[#allocation3 + $0x8] sm:$0xff]  ;;  %v52_v6 = vlaneseq  ;;  %v47_v7 = vstv %s174_s2  ;;  %s139_s22 = smov [#allocation6]   ;;  %s69_s25 = sshll.u32 %s175_s3, 4  ;;  %s70_s25 = int_to_ptr.hbm [resolvable:$true] %s69_s25 }
   0x7   :  { %v83_v1 = vld [vmem:[%s173_s1] ss:$0 sm:$0xff]  ;;  %s67_s23 = sshll.u32 %s139_s22, 4  ;;  %vm57_vm0 = vcmask 130112   ;;  %vm60_vm1 = vcmask 122880   ;;  %s68_s23 = int_to_ptr.vmem [resolvable:$true] %s67_s23 }
   0x8   :  { %v38_v2 = vmul.f32 %v83_v1, %v32_v0  ;;  %v39_v4 = vmul.f32 %v83_v1, %v33_v3  ;;  %v53_v8 = vand.u32 127, %v52_v6 }
   0xa   :  { %40 = vadd.xlane.f32.xlu0 %v38_v2  ;;  %v55_v10 = vadd.s32 4294967288, %v53_v8 }
  0x12   :  { %42 = vadd.xlane.f32.xlu0 %v39_v4 }
  0x7d   :  { %v41_v5 = vpop.xlane.xlu0 %40 }
  0x7e   :  { %v48_v9 = vadd.f32 %v47_v7, %v41_v5 }
  0x80   :  { %v54_v13 = vperm.slane %v48_v9, %v53_v8 }
  0x85   :  { %v43_v11 = vpop.xlane.xlu0 %42 }
  0x86   :  { %v49_v12 = vadd.f32 %v47_v7, %v43_v11 }
  0x88   :  { %v56_v14 = vperm.slane %v49_v12, %v55_v10 }
  0x8a   :  { %v58_v15 = vsel %vm57_vm0, %v56_v14, %v54_v13 }
  0x8b   :  { %61 = vst.msk [vmem:[#allocation6] sm:$0x1] %vm60_vm1, %v58_v15 }
  0x8c   :  { %72 = dma.vmem_to_hbm [thread:$0]  %s68_s23, 16, %s70_s25, [#allocation5]  }
  0x8d   :  { %134 = dma.done.wait [#allocation5], 16  }
  0x8e   :  { %135 = vsyncadd [#allocation5], 4294967280 }
  0x8f   :  { %77 = vsyncpa [#allocation4], 1 }
  0x90   :  { %78 = vsyncpa [#allocation5], 1 }

</bundles_post_ra>
